<compile_context>
chip_gen: v7x
topology: tpu7x:2x2x1
jax: 0.10.0
libtpu: 0.0.40
codegen_flags: <defaults>
</compile_context>

<pallas_src>
import jax
import jax.numpy as jnp
from jax.experimental import pallas as pl
from jax.experimental.pallas import tpu as pltpu

# ----------------------------------------------------------------------------
# Static network dimensions (from the PyTorch module)
# ----------------------------------------------------------------------------
K1, K2, K3 = 7, 5, 3               # conv kernel sizes
C1, C2, C3 = 128, 128, 64          # conv output channels
F1, F2, F3, F4, F5 = 128, 256, 128, 64, 1   # fc output dims

# Slab A (bf16, 128 lanes): [conv1 taps (7 real, padded to 16 rows); conv2 im2col;
#                            fc1; fc3]
A_W1 = 0
A_W2 = 16                          # conv1 rows padded 7 -> 16 (bf16 sublane pack)
A_FW1 = A_W2 + K2 * C1             # 656
A_FW3 = A_FW1 + C3                 # 720
A_ROWS = A_FW3 + F2                # 976
# Slab B (bf16, 64 lanes): [conv3 im2col; fc4]
B_W3 = 0
B_FW4 = K3 * C2                    # 384
B_ROWS = B_FW4 + F3                # 512
# Slab C (bf16, 256 lanes): fc2
# Vector slab (f32, 256 lanes): BN scale/shift, fc biases, fc5 weight row
VEC_W = 256
(VR_S1, VR_T1, VR_S2, VR_T2, VR_S3, VR_T3,
 VR_FB1, VR_FB2, VR_FB3, VR_FB4, VR_FW5, VR_FB5) = range(12)
VEC_ROWS = 16


# ----------------------------------------------------------------------------
# Single fused kernel: conv1+BN+ReLU -> conv2+BN+ReLU -> conv3+BN+ReLU
#                      -> masked mean pool -> fc1..fc5
# ----------------------------------------------------------------------------
def _net_kernel(xcol_ref, pool_ref, wa_ref, wb_ref, wc_ref, vec_ref, out_ref):
    f32, bf16 = jnp.float32, jnp.bfloat16
    R1 = xcol_ref.shape[0]            # B * Lp     (8-aligned)
    R2 = R1 - (K2 - 1)                # conv2 output rows (absolute row indices kept)
    R3 = R2 - (K3 - 1)                # conv3 output rows

    V = vec_ref[...]                                           # (16, 256) f32
    s1, t1 = V[VR_S1:VR_S1 + 1, :C1], V[VR_T1:VR_T1 + 1, :C1]
    s2, t2 = V[VR_S2:VR_S2 + 1, :C2], V[VR_T2:VR_T2 + 1, :C2]
    s3, t3 = V[VR_S3:VR_S3 + 1, :C3], V[VR_T3:VR_T3 + 1, :C3]
    fb1 = V[VR_FB1:VR_FB1 + 1, :F1]
    fb2 = V[VR_FB2:VR_FB2 + 1, :F2]
    fb3 = V[VR_FB3:VR_FB3 + 1, :F3]
    fb4 = V[VR_FB4:VR_FB4 + 1, :F4]
    fw5 = V[VR_FW5:VR_FW5 + 1, :F4]
    fb5 = V[VR_FB5:VR_FB5 + 1, :1]

    def im2col(h, K, rows):
        # rows keep their absolute (batch*Lp + l) index; out-of-window/padded
        # rows feed only padded output rows, which the pooling matrix masks.
        return jnp.concatenate([h[k:k + rows, :] for k in range(K)], axis=1)

    # --- layer1: Conv1d(1,128,7) + BN + ReLU  — one (R1,16)x(16,128) matmul --
    h = jnp.dot(xcol_ref[...].astype(bf16), wa_ref[A_W1:A_W2, :],
                preferred_element_type=f32)
    h = jnp.maximum(h * s1 + t1, 0.0)                          # (R1, 128) f32

    # --- layer2: Conv1d(128,128,5) + BN + ReLU via im2col fat matmul --------
    x2 = im2col(h, K2, R2).astype(bf16)                        # (R2, 640)
    h = jnp.dot(x2, wa_ref[A_W2:A_FW1, :], preferred_element_type=f32)
    h = jnp.maximum(h * s2 + t2, 0.0)                          # (R2, 128)

    # --- layer3: Conv1d(128,64,3) + BN + ReLU via im2col fat matmul ---------
    x3 = im2col(h, K3, R3).astype(bf16)                        # (R3, 384)
    h = jnp.dot(x3, wb_ref[B_W3:B_FW4, :], preferred_element_type=f32)
    h = jnp.maximum(h * s3 + t3, 0.0)                          # (R3, 64)

    # --- AdaptiveAvgPool1d(1): masked mean over valid rows of each batch ----
    # pool[b, b*Lp + l] = 1/L3 for l < L3, else 0 (masks padded rows).
    h = jnp.dot(pool_ref[...], h, preferred_element_type=f32)  # (B, 64) f32

    # --- MLP head (Dropout(0.05) == identity in eval mode) ------------------
    h = jnp.maximum(jnp.dot(h.astype(bf16), wa_ref[A_FW1:A_FW3, :],
                            preferred_element_type=f32) + fb1, 0.0)   # (B, 128)
    h = jnp.maximum(jnp.dot(h.astype(bf16), wc_ref[...],
                            preferred_element_type=f32) + fb2, 0.0)   # (B, 256)
    h = jnp.maximum(jnp.dot(h.astype(bf16), wa_ref[A_FW3:A_ROWS, :],
                            preferred_element_type=f32) + fb3, 0.0)   # (B, 128)
    h = jnp.maximum(jnp.dot(h.astype(bf16), wb_ref[B_FW4:B_ROWS, :],
                            preferred_element_type=f32) + fb4, 0.0)   # (B, 64)

    # --- fc5 (64 -> 1): VPU multiply + lane reduction (no N=1 MXU matmul) ---
    out_ref[...] = jnp.sum(h * fw5, axis=1, keepdims=True) + fb5


def net_forward(x_ncl, p):
    """x_ncl: (B, 1, L) float32, PyTorch Conv1d NCL layout."""
    B, cin, L = x_ncl.shape
    assert cin == 1
    L1 = L - K1 + 1
    L2 = L1 - K2 + 1
    L3 = L2 - K3 + 1
    Lp = ((L1 + 7) // 8) * 8                    # per-batch rows, 8-sublane aligned
    R1 = B * Lp
    R3 = R1 - (K2 - 1) - (K3 - 1)

    # conv1 im2col windows flattened over (batch, padded position); 7 taps
    # padded to 16 columns to match the bf16 weight-slab tile.
    x = x_ncl[:, 0, :]                                               # (B, L)
    win = jnp.stack([x[:, k:k + L1] for k in range(K1)], axis=-1)    # (B, L1, 7)
    win = jnp.pad(win, ((0, 0), (0, Lp - L1), (0, 16 - K1)))         # (B, Lp, 16)
    xcol = win.reshape(R1, 16)

    # Masked mean-pool matrix: pooled[b] = (1/L3) * sum_{l<L3} h3[b*Lp + l].
    rows = jnp.arange(R3)[None, :]
    base = (jnp.arange(B) * Lp)[:, None]
    valid = (rows >= base) & (rows < base + L3)
    pool = jnp.where(valid, 1.0 / L3, 0.0).astype(jnp.float32)       # (B, R3)

    vmem = pl.BlockSpec(memory_space=pltpu.MemorySpace.VMEM)
    return pl.pallas_call(
        _net_kernel,
        out_shape=jax.ShapeDtypeStruct((B, 1), jnp.float32),
        in_specs=[vmem] * 6,
        out_specs=vmem,
    )(xcol, pool, p["wA"], p["wB"], p["wC"], p["vec"])


# ----------------------------------------------------------------------------
# Parameter init (deterministic, synthetic): BN folding, bf16 weight slabs
# ----------------------------------------------------------------------------
def init_params(key, eps=1e-5):
    keys = jax.random.split(key, 40)
    ki = iter(keys)
    f32, bf16 = jnp.float32, jnp.bfloat16

    def nrm(shape, scale=1.0):
        return jax.random.normal(next(ki), shape, f32) * scale

    p = {}

    def conv_block(name, K, cin, cout):
        # weights live in bf16 (slab) — keep the bf16-rounded f32 copy for reference
        w = nrm((K, cin, cout), (K * cin) ** -0.5).astype(bf16).astype(f32)
        b = nrm((cout,), 0.1)
        gamma = 1.0 + 0.1 * nrm((cout,))
        beta = 0.1 * nrm((cout,))
        mean = 0.1 * nrm((cout,))
        var = 1.0 + 0.1 * jnp.abs(nrm((cout,)))
        scale = gamma / jnp.sqrt(var + eps)            # BN fold (running stats)
        shift = (b - mean) * scale + beta
        p[f"w{name}"] = w
        p[f"s{name}"] = scale.reshape(1, cout)
        p[f"t{name}"] = shift.reshape(1, cout)

    conv_block("1", K1, 1, C1)
    conv_block("2", K2, C1, C2)
    conv_block("3", K3, C2, C3)

    def fc(name, fin, fout, quant=True):
        w = nrm((fin, fout), fin ** -0.5)
        if quant:
            w = w.astype(bf16).astype(f32)
        p[f"fw{name}"] = w
        p[f"fb{name}"] = nrm((1, fout), 0.1)

    fc("1", C3, F1)
    fc("2", F1, F2)
    fc("3", F2, F3)
    fc("4", F3, F4)
    fc("5", F4, F5, quant=False)      # fc5 stays f32 (VPU epilogue in the kernel)

    # ---- packed kernel-form slabs ------------------------------------------
    w1seg = jnp.zeros((16, C1), f32).at[:K1].set(p["w1"].reshape(K1, C1))
    wA = jnp.concatenate([w1seg,
                          p["w2"].reshape(K2 * C1, C2),
                          p["fw1"],
                          p["fw3"]], axis=0).astype(bf16)          # (976, 128)
    wB = jnp.concatenate([p["w3"].reshape(K3 * C2, C3),
                          p["fw4"]], axis=0).astype(bf16)          # (512, 64)
    wC = p["fw2"].astype(bf16)                                     # (128, 256)

    def vrow(v):
        v = jnp.ravel(v)
        return jnp.zeros((VEC_W,), f32).at[:v.shape[0]].set(v)

    vec = jnp.stack(
        [vrow(p["s1"]), vrow(p["t1"]), vrow(p["s2"]), vrow(p["t2"]),
         vrow(p["s3"]), vrow(p["t3"]),
         vrow(p["fb1"]), vrow(p["fb2"]), vrow(p["fb3"]), vrow(p["fb4"]),
         vrow(p["fw5"]), vrow(p["fb5"])]
        + [jnp.zeros((VEC_W,), f32)] * (VEC_ROWS - 12))            # (16, 256)

    p["wA"], p["wB"], p["wC"], p["vec"] = wA, wB, wC, vec
    return p


# ----------------------------------------------------------------------------
# Pure-JAX reference (mirrors the kernel's bf16-operand / f32-accumulate math)
# ----------------------------------------------------------------------------
def reference_forward(x_ncl, p):
    bf = lambda a: a.astype(jnp.bfloat16)
    h = jnp.transpose(x_ncl, (0, 2, 1))                  # (B, L, 1) channels-last

    def conv_bn_relu(h, w, s, t):
        K = w.shape[0]
        Lout = h.shape[1] - K + 1
        acc = jnp.zeros((h.shape[0], Lout, w.shape[2]), jnp.float32)
        for k in range(K):
            acc = acc + jnp.einsum("blc,co->blo", bf(h[:, k:k + Lout, :]), bf(w[k]),
                                   preferred_element_type=jnp.float32)
        return jnp.maximum(acc * s + t, 0.0)

    h = conv_bn_relu(h, p["w1"], p["s1"], p["t1"])
    h = conv_bn_relu(h, p["w2"], p["s2"], p["t2"])
    h = conv_bn_relu(h, p["w3"], p["s3"], p["t3"])
    h = jnp.mean(h, axis=1)                              # AdaptiveAvgPool1d(1) + view
    for i in range(1, 5):
        h = jnp.maximum(
            jnp.dot(bf(h), bf(p[f"fw{i}"]), preferred_element_type=jnp.float32)
            + p[f"fb{i}"], 0.0)
    return jnp.dot(h, p["fw5"]) + p["fb5"]               # fc5 in f32, like the kernel


if __name__ == "__main__":
    key = jax.random.PRNGKey(0)
    kx, kp = jax.random.split(key)

    B, L = 2, 32                                         # input (B, 1, L) for nn.Conv1d(1, ...)
    x = jax.random.normal(kx, (B, 1, L), jnp.float32)
    params = init_params(kp)

    fwd = jax.jit(net_forward)
    out = jax.block_until_ready(fwd(x, params))
    assert out.shape == (B, 1), out.shape

    ref = jax.block_until_ready(reference_forward(x, params))
    assert jnp.allclose(out, ref, rtol=1e-2, atol=1e-2), (out, ref)

    print("KERNEL_OK")
</pallas_src>

<mosaic_0001>
module attributes {stable_mosaic.version = 11 : i64} {
  func.func @_net_kernel(%arg0: memref<64x16xf32, #tpu.memory_space<vmem>>, %arg1: memref<2x58xf32, #tpu.memory_space<vmem>>, %arg2: memref<976x128xbf16, #tpu.memory_space<vmem>>, %arg3: memref<512x64xbf16, #tpu.memory_space<vmem>>, %arg4: memref<128x256xbf16, #tpu.memory_space<vmem>>, %arg5: memref<16x256xf32, #tpu.memory_space<vmem>>, %arg6: memref<2x1xf32, #tpu.memory_space<vmem>>) attributes {dimension_semantics = [], scalar_prefetch = 0 : i64, scratch_operands = 0 : i64, tpu.core_type = #tpu.core_type<tc>} {
    %c0 = arith.constant 0 : index
    %c0_0 = arith.constant 0 : index
    %0 = vector.load %arg5[%c0, %c0_0] : memref<16x256xf32, #tpu.memory_space<vmem>>, vector<16x256xf32>
    %1 = vector.extract_strided_slice %0 {offsets = [0, 0], sizes = [1, 128], strides = [1, 1]} : vector<16x256xf32> to vector<1x128xf32>
    %2 = vector.extract_strided_slice %0 {offsets = [1, 0], sizes = [1, 128], strides = [1, 1]} : vector<16x256xf32> to vector<1x128xf32>
    %3 = vector.extract_strided_slice %0 {offsets = [2, 0], sizes = [1, 128], strides = [1, 1]} : vector<16x256xf32> to vector<1x128xf32>
    %4 = vector.extract_strided_slice %0 {offsets = [3, 0], sizes = [1, 128], strides = [1, 1]} : vector<16x256xf32> to vector<1x128xf32>
    %5 = vector.extract_strided_slice %0 {offsets = [4, 0], sizes = [1, 64], strides = [1, 1]} : vector<16x256xf32> to vector<1x64xf32>
    %6 = vector.extract_strided_slice %0 {offsets = [5, 0], sizes = [1, 64], strides = [1, 1]} : vector<16x256xf32> to vector<1x64xf32>
    %7 = vector.extract_strided_slice %0 {offsets = [6, 0], sizes = [1, 128], strides = [1, 1]} : vector<16x256xf32> to vector<1x128xf32>
    %8 = vector.extract_strided_slice %0 {offsets = [7, 0], sizes = [1, 256], strides = [1, 1]} : vector<16x256xf32> to vector<1x256xf32>
    %9 = vector.extract_strided_slice %0 {offsets = [8, 0], sizes = [1, 128], strides = [1, 1]} : vector<16x256xf32> to vector<1x128xf32>
    %10 = vector.extract_strided_slice %0 {offsets = [9, 0], sizes = [1, 64], strides = [1, 1]} : vector<16x256xf32> to vector<1x64xf32>
    %11 = vector.extract_strided_slice %0 {offsets = [10, 0], sizes = [1, 64], strides = [1, 1]} : vector<16x256xf32> to vector<1x64xf32>
    %12 = vector.extract_strided_slice %0 {offsets = [11, 0], sizes = [1, 1], strides = [1, 1]} : vector<16x256xf32> to vector<1x1xf32>
    %c0_1 = arith.constant 0 : index
    %c0_2 = arith.constant 0 : index
    %13 = vector.load %arg0[%c0_1, %c0_2] : memref<64x16xf32, #tpu.memory_space<vmem>>, vector<64x16xf32>
    %14 = arith.truncf %13 : vector<64x16xf32> to vector<64x16xbf16>
    %c0_3 = arith.constant 0 : index
    %c0_4 = arith.constant 0 : index
    %15 = vector.load %arg2[%c0_3, %c0_4] : memref<976x128xbf16, #tpu.memory_space<vmem>>, vector<16x128xbf16>
    %cst = arith.constant dense<0.000000e+00> : vector<64x128xf32>
    %16 = tpu.matmul %14, %15, %cst {dimension_numbers = #tpu.dot_dimension_numbers<[1], [0], [0], [1], [0, 0, 1, 1], [], []>} : vector<64x16xbf16>, vector<16x128xbf16>, vector<64x128xf32> -> vector<64x128xf32>
    %17 = vector.broadcast %1 : vector<1x128xf32> to vector<64x128xf32>
    %18 = arith.mulf %16, %17 : vector<64x128xf32>
    %19 = vector.broadcast %2 : vector<1x128xf32> to vector<64x128xf32>
    %20 = arith.addf %18, %19 : vector<64x128xf32>
    %cst_5 = arith.constant 0.000000e+00 : f32
    %21 = vector.broadcast %cst_5 : f32 to vector<64x128xf32>
    %22 = arith.maximumf %20, %21 : vector<64x128xf32>
    %23 = vector.extract_strided_slice %22 {offsets = [0, 0], sizes = [60, 128], strides = [1, 1]} : vector<64x128xf32> to vector<60x128xf32>
    %24 = vector.extract_strided_slice %22 {offsets = [1, 0], sizes = [60, 128], strides = [1, 1]} : vector<64x128xf32> to vector<60x128xf32>
    %25 = vector.extract_strided_slice %22 {offsets = [2, 0], sizes = [60, 128], strides = [1, 1]} : vector<64x128xf32> to vector<60x128xf32>
    %26 = vector.extract_strided_slice %22 {offsets = [3, 0], sizes = [60, 128], strides = [1, 1]} : vector<64x128xf32> to vector<60x128xf32>
    %27 = vector.extract_strided_slice %22 {offsets = [4, 0], sizes = [60, 128], strides = [1, 1]} : vector<64x128xf32> to vector<60x128xf32>
    %28 = tpu.concatenate %23, %24, %25, %26, %27 in 1 : vector<60x128xf32>, vector<60x128xf32>, vector<60x128xf32>, vector<60x128xf32>, vector<60x128xf32> -> vector<60x640xf32>
    %29 = arith.truncf %28 : vector<60x640xf32> to vector<60x640xbf16>
    %c16 = arith.constant 16 : index
    %c0_6 = arith.constant 0 : index
    %30 = vector.load %arg2[%c16, %c0_6] : memref<976x128xbf16, #tpu.memory_space<vmem>>, vector<640x128xbf16>
    %cst_7 = arith.constant dense<0.000000e+00> : vector<60x128xf32>
    %31 = tpu.matmul %29, %30, %cst_7 {dimension_numbers = #tpu.dot_dimension_numbers<[1], [0], [0], [1], [0, 0, 1, 1], [], []>} : vector<60x640xbf16>, vector<640x128xbf16>, vector<60x128xf32> -> vector<60x128xf32>
    %32 = vector.broadcast %3 : vector<1x128xf32> to vector<60x128xf32>
    %33 = arith.mulf %31, %32 : vector<60x128xf32>
    %34 = vector.broadcast %4 : vector<1x128xf32> to vector<60x128xf32>
    %35 = arith.addf %33, %34 : vector<60x128xf32>
    %cst_8 = arith.constant 0.000000e+00 : f32
    %36 = vector.broadcast %cst_8 : f32 to vector<60x128xf32>
    %37 = arith.maximumf %35, %36 : vector<60x128xf32>
    %38 = vector.extract_strided_slice %37 {offsets = [0, 0], sizes = [58, 128], strides = [1, 1]} : vector<60x128xf32> to vector<58x128xf32>
    %39 = vector.extract_strided_slice %37 {offsets = [1, 0], sizes = [58, 128], strides = [1, 1]} : vector<60x128xf32> to vector<58x128xf32>
    %40 = vector.extract_strided_slice %37 {offsets = [2, 0], sizes = [58, 128], strides = [1, 1]} : vector<60x128xf32> to vector<58x128xf32>
    %41 = tpu.concatenate %38, %39, %40 in 1 : vector<58x128xf32>, vector<58x128xf32>, vector<58x128xf32> -> vector<58x384xf32>
    %42 = arith.truncf %41 : vector<58x384xf32> to vector<58x384xbf16>
    %c0_9 = arith.constant 0 : index
    %c0_10 = arith.constant 0 : index
    %43 = vector.load %arg3[%c0_9, %c0_10] : memref<512x64xbf16, #tpu.memory_space<vmem>>, vector<384x64xbf16>
    %cst_11 = arith.constant dense<0.000000e+00> : vector<58x64xf32>
    %44 = tpu.matmul %42, %43, %cst_11 {dimension_numbers = #tpu.dot_dimension_numbers<[1], [0], [0], [1], [0, 0, 1, 1], [], []>} : vector<58x384xbf16>, vector<384x64xbf16>, vector<58x64xf32> -> vector<58x64xf32>
    %45 = vector.broadcast %5 : vector<1x64xf32> to vector<58x64xf32>
    %46 = arith.mulf %44, %45 : vector<58x64xf32>
    %47 = vector.broadcast %6 : vector<1x64xf32> to vector<58x64xf32>
    %48 = arith.addf %46, %47 : vector<58x64xf32>
    %cst_12 = arith.constant 0.000000e+00 : f32
    %49 = vector.broadcast %cst_12 : f32 to vector<58x64xf32>
    %50 = arith.maximumf %48, %49 : vector<58x64xf32>
    %c0_13 = arith.constant 0 : index
    %c0_14 = arith.constant 0 : index
    %51 = vector.load %arg1[%c0_13, %c0_14] : memref<2x58xf32, #tpu.memory_space<vmem>>, vector<2x58xf32>
    %cst_15 = arith.constant dense<0.000000e+00> : vector<2x64xf32>
    %52 = tpu.matmul %51, %50, %cst_15 {dimension_numbers = #tpu.dot_dimension_numbers<[1], [0], [0], [1], [0, 0, 1, 1], [], []>} : vector<2x58xf32>, vector<58x64xf32>, vector<2x64xf32> -> vector<2x64xf32>
    %53 = arith.truncf %52 : vector<2x64xf32> to vector<2x64xbf16>
    %c656 = arith.constant 656 : index
    %c0_16 = arith.constant 0 : index
    %54 = vector.load %arg2[%c656, %c0_16] : memref<976x128xbf16, #tpu.memory_space<vmem>>, vector<64x128xbf16>
    %cst_17 = arith.constant dense<0.000000e+00> : vector<2x128xf32>
    %55 = tpu.matmul %53, %54, %cst_17 {dimension_numbers = #tpu.dot_dimension_numbers<[1], [0], [0], [1], [0, 0, 1, 1], [], []>} : vector<2x64xbf16>, vector<64x128xbf16>, vector<2x128xf32> -> vector<2x128xf32>
    %56 = vector.broadcast %7 : vector<1x128xf32> to vector<2x128xf32>
    %57 = arith.addf %55, %56 : vector<2x128xf32>
    %cst_18 = arith.constant 0.000000e+00 : f32
    %58 = vector.broadcast %cst_18 : f32 to vector<2x128xf32>
    %59 = arith.maximumf %57, %58 : vector<2x128xf32>
    %60 = arith.truncf %59 : vector<2x128xf32> to vector<2x128xbf16>
    %c0_19 = arith.constant 0 : index
    %c0_20 = arith.constant 0 : index
    %61 = vector.load %arg4[%c0_19, %c0_20] : memref<128x256xbf16, #tpu.memory_space<vmem>>, vector<128x256xbf16>
    %cst_21 = arith.constant dense<0.000000e+00> : vector<2x256xf32>
    %62 = tpu.matmul %60, %61, %cst_21 {dimension_numbers = #tpu.dot_dimension_numbers<[1], [0], [0], [1], [0, 0, 1, 1], [], []>} : vector<2x128xbf16>, vector<128x256xbf16>, vector<2x256xf32> -> vector<2x256xf32>
    %63 = vector.broadcast %8 : vector<1x256xf32> to vector<2x256xf32>
    %64 = arith.addf %62, %63 : vector<2x256xf32>
    %cst_22 = arith.constant 0.000000e+00 : f32
    %65 = vector.broadcast %cst_22 : f32 to vector<2x256xf32>
    %66 = arith.maximumf %64, %65 : vector<2x256xf32>
    %67 = arith.truncf %66 : vector<2x256xf32> to vector<2x256xbf16>
    %c720 = arith.constant 720 : index
    %c0_23 = arith.constant 0 : index
    %68 = vector.load %arg2[%c720, %c0_23] : memref<976x128xbf16, #tpu.memory_space<vmem>>, vector<256x128xbf16>
    %cst_24 = arith.constant dense<0.000000e+00> : vector<2x128xf32>
    %69 = tpu.matmul %67, %68, %cst_24 {dimension_numbers = #tpu.dot_dimension_numbers<[1], [0], [0], [1], [0, 0, 1, 1], [], []>} : vector<2x256xbf16>, vector<256x128xbf16>, vector<2x128xf32> -> vector<2x128xf32>
    %70 = vector.broadcast %9 : vector<1x128xf32> to vector<2x128xf32>
    %71 = arith.addf %69, %70 : vector<2x128xf32>
    %cst_25 = arith.constant 0.000000e+00 : f32
    %72 = vector.broadcast %cst_25 : f32 to vector<2x128xf32>
    %73 = arith.maximumf %71, %72 : vector<2x128xf32>
    %74 = arith.truncf %73 : vector<2x128xf32> to vector<2x128xbf16>
    %c384 = arith.constant 384 : index
    %c0_26 = arith.constant 0 : index
    %75 = vector.load %arg3[%c384, %c0_26] : memref<512x64xbf16, #tpu.memory_space<vmem>>, vector<128x64xbf16>
    %cst_27 = arith.constant dense<0.000000e+00> : vector<2x64xf32>
    %76 = tpu.matmul %74, %75, %cst_27 {dimension_numbers = #tpu.dot_dimension_numbers<[1], [0], [0], [1], [0, 0, 1, 1], [], []>} : vector<2x128xbf16>, vector<128x64xbf16>, vector<2x64xf32> -> vector<2x64xf32>
    %77 = vector.broadcast %10 : vector<1x64xf32> to vector<2x64xf32>
    %78 = arith.addf %76, %77 : vector<2x64xf32>
    %cst_28 = arith.constant 0.000000e+00 : f32
    %79 = vector.broadcast %cst_28 : f32 to vector<2x64xf32>
    %80 = arith.maximumf %78, %79 : vector<2x64xf32>
    %81 = vector.broadcast %11 : vector<1x64xf32> to vector<2x64xf32>
    %82 = arith.mulf %80, %81 : vector<2x64xf32>
    %cst_29 = arith.constant dense<0.000000e+00> : vector<2xf32>
    %83 = vector.multi_reduction <add>, %82, %cst_29 [1] : vector<2x64xf32> to vector<2xf32>
    %84 = vector.shape_cast %83 : vector<2xf32> to vector<2x1xf32>
    %85 = vector.broadcast %12 : vector<1x1xf32> to vector<2x1xf32>
    %86 = arith.addf %84, %85 : vector<2x1xf32>
    %c0_30 = arith.constant 0 : index
    %c0_31 = arith.constant 0 : index
    %87 = vector.load %arg6[%c0_30, %c0_31] : memref<2x1xf32, #tpu.memory_space<vmem>>, vector<2x1xf32>
    tpu.vector_store %arg6[%c0_30, %c0_31], %86 {strides = array<i32>} : memref<2x1xf32, #tpu.memory_space<vmem>>, vector<2x1xf32>,
    return
  }
}

</mosaic_0001>

<bundles_post_ra>
// kernel: net_forward.1
= control target key start
LH: loop header
LB: loop body
LE: loop exit
PB: predicated region body
PF: predicated region fallthrough
CT: control target
= control target key end

     0   :  { %11 = vsyncpa [#allocation3], 0  ;;  %s2459_s21 = smov [#allocation2]   ;;  %s3015_s0 = inlined_call_operand.vmem [shape: f32[64,16], index: 0, kind: input, shape index: {}]   ;;  %s3016_s1 = inlined_call_operand.vmem [shape: f32[2,58], index: 1, kind: input, shape index: {}]   ;;  %s3017_s2 = inlined_call_operand.vmem [shape: bf16[976,128], index: 2, kind: input, shape index: {}]   ;;  %s3018_s3 = inlined_call_operand.vmem [shape: bf16[512,64], index: 3, kind: input, shape index: {}]   ;;  %s3019_s4 = inlined_call_operand.hbm [shape: bf16[128,256], index: 4, kind: input, shape index: {}]   ;;  %s3020_s5 = inlined_call_operand.vmem [shape: f32[16,256], index: 5, kind: input, shape index: {}]   ;;  %s3021_s6 = inlined_call_operand.vmem [shape: f32[2,1], index: 6, kind: output, shape index: {}]  }
   0x1   :  { %s25_s22 = sshll.u32 %s2459_s21, 4  ;;  %s2435_s25 = scalar_lea.hbm %s3019_s4, 2048  ;;  %s26_s22 = int_to_ptr.vmem [resolvable:$true] %s25_s22 }
   0x2   :  { %p2436_p0 = scmp.ne.s32.totalorder %s3019_s4, %s2435_s25  ;;  %p2439_p1 = scmp.lt.u32.totalorder %s2435_s25, %s3019_s4 }
   0x4   :  { %p2441_p2 = pnand %p2439_p1, %p2436_p0 }
   0x6   :  { %2444 = shalt.err (!%p2441_p2)
}
   0x7   :  { %s2445_s30 = scalar_lea.vmem %s26_s22, 2048  ;;  %p2450_p4 = scmp.lt.s32.totalorder %s26_s22, %s26_s22 }
   0x8   :  { %p2446_p3 = scmp.ne.s32.totalorder %s26_s22, %s2445_s30  ;;  %p2451_p5 = scmp.lt.s32.totalorder %s2445_s30, %s2445_s30 }
   0xa   :  { %p2452_p6 = por %p2451_p5, %p2450_p4 }
   0xc   :  { %p2453_p7 = pnand %p2452_p6, %p2446_p3 }
   0xe   :  { %2456 = shalt.err (!%p2453_p7)
}
   0xf   :  { %s2460_s7 = smov 128   ;;  %s2461_s8 = smov 8  }
  0x10   :  { %31 = dma.hbm_to_vmem [thread:$0]  %s3019_s4, 2048, %s26_s22, [#allocation3], %s2460_s7, %s2460_s7, %s2461_s8  }
  0x11   :  { %2457 = dma.done.wait [#allocation3], 2048  }
  0x12   :  { %2458 = vsyncadd [#allocation3], 4294965248  ;;  %v2317_v0 = vld [vmem:[%s3017_s2] sm:$0xff]   ;;  %v42_v2 = vld [vmem:[%s3015_s0 + $0x8] sm:$0xff]  ;;  %vm61_vm0 = vcmask 130048   ;;  %v139_v46 = vlaneseq  ;;  %vm179_vm1 = vcmask 1046528  }
  0x13   :  { %v41_v1 = vld [vmem:[%s3015_s0] sm:$0xff]  ;;  %v43_v3 = vld [vmem:[%s3015_s0 + $0x10] sm:$0xff]  ;;  %2187 = vmatprep.subr.bf16.mxu1 %v2317_v0  ;;  %v44_v5 = vld [vmem:[%s3015_s0 + $0x18] sm:$0xff]  ;;  %vm227_vm2 = vcmask 1044480   ;;  %vm203_vm3 = vcmask 1045504   ;;  %vm251_vm4 = vcmask 1043456  }
  0x14   :  { %v49_v4 = vpack.c.bf16 %v42_v2, %v41_v1  ;;  %v45_v6 = vld [vmem:[%s3015_s0 + $0x20] sm:$0xff]  ;;  %v46_v7 = vld [vmem:[%s3015_s0 + $0x28] sm:$0xff]  ;;  %2188 = vmatpush3.bf16.msra.mxu1 %v2317_v0  ;;  %v50_v8 = vpack.c.bf16 %v44_v5, %v43_v3  ;;  %v47_v11 = vld [vmem:[%s3015_s0 + $0x30] sm:$0xff]  ;;  %v2647_v47 = vshrl.u32 %v139_v46, 7  ;;  %vm2463_vm5 = vmmov 0  }
  0x15   :  { %v51_v9 = vpack.c.bf16 %v46_v7, %v45_v6  ;;  %v2318_v10 = vld [vmem:[%s3017_s2 + $0x48] sm:$0xff]   ;;  %v48_v12 = vld [vmem:[%s3015_s0 + $0x38] sm:$0xff]  ;;  %v2322_v16 = vld [vmem:[%s3017_s2 + $0x50] sm:$0xff]   ;;  %vm1267_vm6 = vcmask 1041408   ;;  %vm2465_vm7 = vmmov 1   ;;  %vm1263_vm9 = vcmask 474112  }
  0x16   :  { %2189 = vmatprep.mubr.msk.bf16.mxu1 %vm61_vm0, %v49_v4  ;;  %v2319_v13 = vld [vmem:[%s3017_s2 + $0xc8] sm:$0xff]   ;;  %1998 = vmatprep.subr.bf16.mxu1 %v2318_v10  ;;  %v2323_v17 = vld [vmem:[%s3017_s2 + $0xd0] sm:$0xff]   ;;  %v52_v18 = vpack.c.bf16 %v48_v12, %v47_v11  ;;  %v2326_v21 = vld [vmem:[%s3017_s2 + $0x58] sm:$0xff]   ;;  %v141_v48 = vsub.s32 0, %v2647_v47  ;;  %v153_v50 = vsub.s32 1, %v2647_v47  ;;  %vm1378_vm10 = vcmask 523264  }
  0x17   :  { %2190 = vmatmul.mubr.msk.bf16.vlgmr.msra.gmra.mrb[0].mxu1 %vm61_vm0, %v50_v8  ;;  %v2320_v14 = vld [vmem:[%s3017_s2 + $0x8] sm:$0xff]   ;;  %2038 = vmatprep.subr.bf16.mxu0 %v2319_v13  ;;  %v2324_v19 = vld [vmem:[%s3017_s2 + $0x10] sm:$0xff]   ;;  %v2327_v22 = vld [vmem:[%s3017_s2 + $0xd8] sm:$0xff]   ;;  %vm1861_vm11 = vcmask 517120   ;;  %vm1870_vm12 = vcmask 1024  }
  0x18   :  { %2193 = vmatprep.mubr.msk.bf16.mxu1 %vm61_vm0, %v51_v9  ;;  %v2321_v15 = vld [vmem:[%s3017_s2 + $0x88] sm:$0xff]   ;;  %1999 = vmatpush3.bf16.msra.mxu1 %v2320_v14  ;;  %v2325_v20 = vld [vmem:[%s3017_s2 + $0x90] sm:$0xff]   ;;  %v2328_v23 = vld [vmem:[%s3017_s2 + $0x18] sm:$0xff]  }
  0x19   :  { %2039 = vmatpush3.bf16.msra.mxu0 %v2321_v15  ;;  %2000 = vmatprep.subr.bf16.mxu1 %v2322_v16  ;;  %v2329_v24 = vld [vmem:[%s3017_s2 + $0x98] sm:$0xff]   ;;  %v2330_v25 = vld [vmem:[%s3017_s2 + $0x60] sm:$0xff]   ;;  %v2334_v29 = vld [vmem:[%s3017_s2 + $0x68] sm:$0xff]  }
  0x1a   :  { %2040 = vmatprep.subr.bf16.mxu0 %v2323_v17  ;;  %v2331_v26 = vld [vmem:[%s3017_s2 + $0xe0] sm:$0xff]   ;;  %v2335_v30 = vld [vmem:[%s3017_s2 + $0xe8] sm:$0xff]   ;;  %v2338_v33 = vld [vmem:[%s3017_s2 + $0x70] sm:$0xff]  }
  0x1b   :  { %v2332_v27 = vld [vmem:[%s3017_s2 + $0x20] sm:$0xff]   ;;  %v2336_v31 = vld [vmem:[%s3017_s2 + $0x28] sm:$0xff]   ;;  %v2339_v34 = vld [vmem:[%s3017_s2 + $0xf0] sm:$0xff]  }
  0x1c   :  { %2001 = vmatpush3.bf16.msra.mxu1 %v2324_v19  ;;  %v2333_v28 = vld [vmem:[%s3017_s2 + $0xa0] sm:$0xff]   ;;  %v2337_v32 = vld [vmem:[%s3017_s2 + $0xa8] sm:$0xff]   ;;  %v2340_v35 = vld [vmem:[%s3017_s2 + $0x30] sm:$0xff]  }
  0x1d   :  { %2041 = vmatpush3.bf16.msra.mxu0 %v2325_v20  ;;  %2002 = vmatprep.subr.bf16.mxu1 %v2326_v21  ;;  %v2341_v36 = vld [vmem:[%s3017_s2 + $0xb0] sm:$0xff]   ;;  %v2342_v37 = vld [vmem:[%s3017_s2 + $0x78] sm:$0xff]   ;;  %v2346_v41 = vld [vmem:[%s3017_s2 + $0x80] sm:$0xff]  }
  0x1e   :  { %2042 = vmatprep.subr.bf16.mxu0 %v2327_v22  ;;  %v2343_v38 = vld [vmem:[%s3017_s2 + $0xf8] sm:$0xff]   ;;  %v2347_v42 = vld [vmem:[%s3017_s2 + $0x100] sm:$0xff]   ;;  %v2644_v45 = vld [vmem:[%s3017_s2 + $0x108] sm:$0xff]  }
  0x1f   :  { %2194 = vmatmul.mubr.msk.bf16.gmra.mrb[4].mxu1 %vm61_vm0, %v52_v18  ;;  %v2344_v39 = vld [vmem:[%s3017_s2 + $0x38] sm:$0xff]   ;;  %v2348_v43 = vld [vmem:[%s3017_s2 + $0x40] sm:$0xff]   ;;  %vm2307_vm8 = vmpackc.low %vm1267_vm6, %vm2465_vm7 }
  0x20   :  { %2003 = vmatpush3.bf16.msra.mxu1 %v2328_v23  ;;  %v2345_v40 = vld [vmem:[%s3017_s2 + $0xb8] sm:$0xff]   ;;  %v2349_v44 = vld [vmem:[%s3017_s2 + $0xc0] sm:$0xff]  }
  0x21   :  { %2043 = vmatpush3.bf16.msra.mxu0 %v2329_v24  ;;  %2004 = vmatprep.subr.bf16.mxu1 %v2330_v25  ;;  %v2653_v49 = vld [vmem:[%s3020_s5] sm:$0xff] }
  0x22   :  { %2044 = vmatprep.subr.bf16.mxu0 %v2331_v26  ;;  %v142_v51 = vrot.slane %v2653_v49, %v141_v48  ;;  %v154_v52 = vrot.slane %v2653_v49, %v153_v50 }
  0x24   :  { %2005 = vmatpush3.bf16.msra.mxu1 %v2332_v27 }
  0x25   :  { %2045 = vmatpush3.bf16.msra.mxu0 %v2333_v28  ;;  %2006 = vmatprep.subr.bf16.mxu1 %v2334_v29 }
  0x26   :  { %2046 = vmatprep.subr.bf16.mxu0 %v2335_v30 }
  0x28   :  { %2007 = vmatpush3.bf16.msra.mxu1 %v2336_v31 }
  0x29   :  { %2047 = vmatpush3.bf16.msra.mxu0 %v2337_v32  ;;  %2008 = vmatprep.subr.bf16.mxu1 %v2338_v33 }
  0x2a   :  { %2048 = vmatprep.subr.bf16.mxu0 %v2339_v34 }
  0x2c   :  { %2009 = vmatpush3.bf16.msra.mxu1 %v2340_v35 }
  0x2d   :  { %2049 = vmatpush3.bf16.msra.mxu0 %v2341_v36  ;;  %2010 = vmatprep.subr.bf16.mxu1 %v2342_v37 }
  0x2e   :  { %2050 = vmatprep.subr.bf16.mxu0 %v2343_v38 }
  0x30   :  { %2011 = vmatpush3.bf16.msra.mxu1 %v2344_v39  ;;  %v2351_v39 = vld [vmem:[%s3017_s2 + $0x110] sm:$0xff]  }
  0x31   :  { %2051 = vmatpush3.bf16.msra.mxu0 %v2345_v40  ;;  %2012 = vmatprep.subr.bf16.mxu1 %v2346_v41 }
  0x32   :  { %2052 = vmatprep.subr.bf16.mxu0 %v2347_v42 }
  0x34   :  { %2013 = vmatpush3.bf16.msra.mxu1 %v2348_v43 }
  0x35   :  { %2053 = vmatpush3.bf16.msra.mxu0 %v2349_v44  ;;  %2197 = vmatprep.subr.bf16.mxu1 %v2644_v45 }
  0xea   :  { %v2191_v53 = vpop.f32.mrb[0].mxu1 }
  0xeb   :  { %v145_v54 = vmul.f32 %v2191_v53, %v142_v51  ;;  %v108_v55 = vpop.f32.mrb[1].mxu1 }
  0xec   :  { %v143_v56 = vmul.f32 %v142_v51, %v108_v55  ;;  %v2192_v57 = vpop.f32.mrb[2].mxu1 }
  0xed   :  { %v157_v58 = vadd.f32 %v154_v52, %v145_v54  ;;  %v146_v59 = vmul.f32 %v2192_v57, %v142_v51  ;;  %v111_v60 = vpop.f32.mrb[3].mxu1 }
  0xee   :  { %v155_v61 = vadd.f32 %v154_v52, %v143_v56  ;;  %v144_v62 = vmul.f32 %v142_v51, %v111_v60 }
  0xef   :  { %v2662_v63 = vmax.f32 %v157_v58, 0.0  ;;  %v158_v0 = vadd.f32 %v154_v52, %v146_v59  ;;  %v2352_v58 = vld [vmem:[%s3017_s2 + $0x118] sm:$0xff]  }
  0xf0   :  { %v2664_v1 = vmax.f32 %v155_v61, 0.0  ;;  %v156_v2 = vadd.f32 %v154_v52, %v144_v62 }
  0xf1   :  { %v2666_v3 = vmax.f32 %v158_v0, 0.0  ;;  %v183_v4 = vrot.slane %v2662_v63, 1  ;;  %v231_v5 = vrot.slane %v2662_v63, 3  ;;  %v207_v6 = vrot.slane %v2662_v63, 2 }
  0xf2   :  { %v2671_v7 = vmax.f32 %v156_v2, 0.0  ;;  %v2195_v8 = vpop.f32.mrb[4].mxu1  ;;  %v180_v9 = vrot.slane %v2664_v1, 1  ;;  %v228_v10 = vrot.slane %v2664_v1, 3  ;;  %v204_v11 = vrot.slane %v2664_v1, 2 }
  0xf3   :  { %v257_v12 = vrot.slane %v2666_v3, 4  ;;  %v149_v13 = vmul.f32 %v2195_v8, %v142_v51  ;;  %v124_v14 = vpop.f32.mrb[5].mxu1  ;;  %v185_v15 = vrot.slane %v2666_v3, 1  ;;  %v233_v16 = vrot.slane %v2666_v3, 3 }
  0xf4   :  { %v147_v17 = vmul.f32 %v142_v51, %v124_v14  ;;  %v2196_v18 = vpop.f32.mrb[6].mxu1  ;;  %v181_v19 = vrot.slane %v2671_v7, 1  ;;  %v229_v20 = vrot.slane %v2671_v7, 3  ;;  %v275_v21 = vpack.c.bf16 %v2671_v7, %v2664_v1 }
  0xf5   :  { %v161_v22 = vadd.f32 %v154_v52, %v149_v13  ;;  %v150_v23 = vmul.f32 %v2196_v18, %v142_v51  ;;  %v127_v24 = vpop.f32.mrb[7].mxu1  ;;  %v205_v25 = vrot.slane %v2671_v7, 2  ;;  %v186_v26 = vsel %vm179_vm1, %v183_v4, %v185_v15 }
  0xf6   :  { %v159_v27 = vadd.f32 %v154_v52, %v147_v17  ;;  %v148_v28 = vmul.f32 %v142_v51, %v127_v24  ;;  %v182_v29 = vsel %vm179_vm1, %v180_v9, %v181_v19  ;;  %v184_v30 = vsel %vm179_vm1, %v181_v19, %v183_v4 }
  0xf7   :  { %v2687_v31 = vmax.f32 %v161_v22, 0.0  ;;  %v162_v32 = vadd.f32 %v154_v52, %v150_v23  ;;  %v276_v33 = vpack.c.bf16 %v184_v30, %v182_v29  ;;  %v230_v34 = vsel %vm227_vm2, %v228_v10, %v229_v20 }
  0xf8   :  { %v2690_v35 = vmax.f32 %v159_v27, 0.0  ;;  %v160_v36 = vadd.f32 %v154_v52, %v148_v28  ;;  %v232_v37 = vsel %vm227_vm2, %v229_v20, %v231_v5  ;;  %v206_v38 = vsel %vm203_vm3, %v204_v11, %v205_v25 }
  0xf9   :  { %v2697_v40 = vmax.f32 %v162_v32, 0.0  ;;  %647 = vmatprep.mubr.bf16.mxu1 %v276_v33  ;;  %v278_v41 = vpack.c.bf16 %v232_v37, %v230_v34  ;;  %v208_v42 = vsel %vm203_vm3, %v205_v25, %v207_v6  ;;  %v234_v43 = vsel %vm227_vm2, %v231_v5, %v233_v16 }
  0xfa   :  { %v259_v44 = vrot.slane %v2690_v35, 4  ;;  %v2702_v46 = vmax.f32 %v160_v36, 0.0  ;;  %648 = vmatmul.mubr.bf16.vlgmr.msra.gmra.mrb[8].mxu1 %v275_v21  ;;  %v277_v51 = vpack.c.bf16 %v208_v42, %v206_v38  ;;  %v187_v52 = vrot.slane %v2690_v35, 1 }
  0xfb   :  { %712 = vmatprep.mubr.bf16.mxu0 %v278_v41  ;;  %2198 = vmatpush3.bf16.msra.mxu1 %v2644_v45  ;;  %v235_v53 = vrot.slane %v2690_v35, 3  ;;  %v280_v54 = vpack.c.bf16 %v2666_v3, %v2662_v63  ;;  %v209_v55 = vrot.slane %v2666_v3, 2  ;;  %v211_v56 = vrot.slane %v2690_v35, 2 }
  0xfc   :  { %713 = vmatmul.mubr.bf16.vlgmr.msra.gmra.mrb[0].mxu0 %v277_v51  ;;  %2199 = vmatprep.subr.bf16.mxu1 %v2351_v39  ;;  %v188_v57 = vsel %vm179_vm1, %v185_v15, %v187_v52  ;;  %v189_v59 = vrot.slane %v2702_v46, 1  ;;  %v191_v45 = vrot.slane %v2687_v31, 1  ;;  %v237_v60 = vrot.slane %v2702_v46, 3 }
  0xfd   :  { %v281_v61 = vpack.c.bf16 %v188_v57, %v186_v26  ;;  %v236_v62 = vsel %vm227_vm2, %v233_v16, %v235_v53  ;;  %v210_v0 = vsel %vm203_vm3, %v207_v6, %v209_v55  ;;  %v212_v2 = vsel %vm203_vm3, %v209_v55, %v211_v56  ;;  %v2353_v6 = vld [vmem:[%s3017_s2 + $0x120] sm:$0xff]   ;;  %v2360_v55 = vld [vmem:[%s3018_s3 + $0x48] sm:$0xff]  }
  0xfe   :  { %v283_v4 = vpack.c.bf16 %v236_v62, %v234_v43  ;;  %v282_v5 = vpack.c.bf16 %v212_v2, %v210_v0  ;;  %v190_v8 = vsel %vm179_vm1, %v187_v52, %v189_v59  ;;  %v192_v9 = vsel %vm179_vm1, %v189_v59, %v191_v45  ;;  %v2361_v57 = vld [vmem:[%s3018_s3 + $0x8] sm:$0xff]   ;;  %v2364_v59 = vld [vmem:[%s3018_s3 + $0x10] sm:$0xff]   ;;  %v2367_v62 = vld [vmem:[%s3018_s3 + $0x18] sm:$0xff]  }
  0xff   :  { %655 = vmatprep.mubr.bf16.mxu1 %v281_v61  ;;  %2200 = vmatpush3.bf16.msra.mxu1 %v2351_v39  ;;  %v286_v10 = vpack.c.bf16 %v192_v9, %v190_v8  ;;  %v238_v11 = vsel %vm227_vm2, %v235_v53, %v237_v60  ;;  %v239_v13 = vrot.slane %v2687_v31, 3  ;;  %v285_v14 = vpack.c.bf16 %v2702_v46, %v2690_v35  ;;  %v2356_v35 = vld [vmem:[%s3017_s2 + $0x138] sm:$0xff]   ;;  %v2368_v61 = vld [vmem:[%s3018_s3 + $0x90] sm:$0xff]   ;;  %v2369_v0 = vld [vmem:[%s3018_s3 + $0x60] sm:$0xff]  }
 0x100   :  { %720 = vmatprep.mubr.bf16.mxu0 %v283_v4  ;;  %2201 = vmatprep.subr.bf16.mxu1 %v2352_v58  ;;  %v213_v15 = vrot.slane %v2702_v46, 2  ;;  %v215_v16 = vrot.slane %v2687_v31, 2  ;;  %v193_v17 = vrot.slane %v2697_v40, 1  ;;  %v241_v18 = vrot.slane %v2697_v40, 3  ;;  %v2370_v2 = vld [vmem:[%s3018_s3 + $0x20] sm:$0xff]   ;;  %v2371_v4 = vld [vmem:[%s3018_s3 + $0x98] sm:$0xff]  }
 0x101   :  { %v240_v19 = vsel %vm227_vm2, %v237_v60, %v239_v13  ;;  %v290_v20 = vpack.c.bf16 %v2697_v40, %v2687_v31  ;;  %v217_v21 = vrot.slane %v2697_v40, 2  ;;  %v252_v22 = vrot.slane %v2664_v1, 4  ;;  %v2354_v1 = vld [vmem:[%s3017_s2 + $0x128] sm:$0xff]   ;;  %v2366_v60 = vld [vmem:[%s3018_s3 + $0x58] sm:$0xff]   ;;  %v2374_v8 = vld [vmem:[%s3018_s3 + $0xa0] sm:$0xff]  }
 0x102   :  { %656 = vmatmul.mubr.bf16.gmra.mrb[12].mxu1 %v280_v54  ;;  %v288_v23 = vpack.c.bf16 %v240_v19, %v238_v11  ;;  %v214_v24 = vsel %vm203_vm3, %v211_v56, %v213_v15  ;;  %v216_v25 = vsel %vm203_vm3, %v213_v15, %v215_v16  ;;  %v194_v26 = vsel %vm179_vm1, %v191_v45, %v193_v17  ;;  %v2359_v54 = vld [vmem:[%s3018_s3] sm:$0xff]   ;;  %v2365_v45 = vld [vmem:[%s3018_s3 + $0x88] sm:$0xff]   ;;  %v2376_v11 = vld [vmem:[%s3018_s3 + $0x30] sm:$0xff]  }
 0x103   :  { %663 = vmatprep.mubr.bf16.mxu1 %v286_v10  ;;  %2202 = vmatpush3.bf16.msra.mxu1 %v2352_v58  ;;  %v287_v27 = vpack.c.bf16 %v216_v25, %v214_v24  ;;  %v291_v28 = vpack.c.bf16 %v193_v17, %v194_v26  ;;  %v242_v29 = vsel %vm227_vm2, %v239_v13, %v241_v18  ;;  %v253_v30 = vrot.slane %v2671_v7, 4  ;;  %v2362_v56 = vld [vmem:[%s3018_s3 + $0x80] sm:$0xff]   ;;  %v2363_v58 = vld [vmem:[%s3018_s3 + $0x50] sm:$0xff]   ;;  %v2373_v9 = vld [vmem:[%s3018_s3 + $0x28] sm:$0xff]  }
 0x104   :  { %721 = vmatmul.mubr.bf16.gmra.mrb[4].mxu0 %v282_v5  ;;  %2203 = vmatprep.subr.bf16.mxu1 %v2353_v6  ;;  %v293_v32 = vpack.c.bf16 %v241_v18, %v242_v29  ;;  %v218_v33 = vsel %vm203_vm3, %v215_v16, %v217_v21  ;;  %v255_v34 = vrot.slane %v2662_v63, 4  ;;  %v260_v36 = vsel %vm251_vm4, %v257_v12, %v259_v44  ;;  %v2372_v5 = vld [vmem:[%s3018_s3 + $0x68] sm:$0xff]   ;;  %v2375_v10 = vld [vmem:[%s3018_s3 + $0x70] sm:$0xff]   ;;  %v2379_v15 = vld [vmem:[%s3018_s3 + $0x38] sm:$0xff]  }
 0x105   :  { %728 = vmatprep.mubr.bf16.mxu0 %v288_v23  ;;  %v292_v37 = vpack.c.bf16 %v217_v21, %v218_v33  ;;  %v254_v7 = vsel %vm251_vm4, %v252_v22, %v253_v30  ;;  %v261_v38 = vrot.slane %v2702_v46, 4  ;;  %v263_v39 = vrot.slane %v2687_v31, 4  ;;  %v2355_v31 = vld [vmem:[%s3017_s2 + $0x130] sm:$0xff]   ;;  %v2377_v13 = vld [vmem:[%s3018_s3 + $0xa8] sm:$0xff]   ;;  %v2381_v16 = vld [vmem:[%s3018_s3 + $0xb8] sm:$0xff]  }
 0x106   :  { %v256_v41 = vsel %vm251_vm4, %v253_v30, %v255_v34  ;;  %v258_v63 = vsel %vm251_vm4, %v255_v34, %v257_v12  ;;  %v265_v42 = vrot.slane %v2697_v40, 4  ;;  %v2357_v40 = vld [vmem:[%s3017_s2 + $0x140] sm:$0xff]  }
 0x107   :  { %2204 = vmatpush3.bf16.msra.mxu1 %v2353_v6  ;;  %v279_v43 = vpack.c.bf16 %v256_v41, %v254_v7  ;;  %v284_v51 = vpack.c.bf16 %v260_v36, %v258_v63  ;;  %v262_v52 = vsel %vm251_vm4, %v259_v44, %v261_v38  ;;  %v264_v53 = vsel %vm251_vm4, %v261_v38, %v263_v39  ;;  %v2358_v44 = vld [vmem:[%s3018_s3 + $0x40] sm:$0xff]   ;;  %v2380_v6 = vld [vmem:[%s3018_s3 + $0xb0] sm:$0xff]  }
 0x108   :  { %2205 = vmatprep.subr.bf16.mxu1 %v2354_v1  ;;  %v289_v46 = vpack.c.bf16 %v264_v53, %v262_v52  ;;  %v266_v3 = vsel %vm251_vm4, %v263_v39, %v265_v42  ;;  %2090 = vmatprep.subr.bf16.mxu0 %v2358_v44 }
 0x109   :  { %v294_v12 = vpack.c.bf16 %v265_v42, %v266_v3  ;;  %2091 = vmatpush3.bf16.msra.mxu0 %v2359_v54 }
 0x10a   :  { %664 = vmatmul.mubr.bf16.gmra.mrb[16].mxu1 %v285_v14  ;;  %2092 = vmatprep.subr.bf16.mxu0 %v2360_v55  ;;  %v2378_v14 = vld [vmem:[%s3018_s3 + $0x78] sm:$0xff]  }
 0x10b   :  { %671 = vmatprep.mubr.bf16.mxu1 %v291_v28  ;;  %2206 = vmatpush3.bf16.msra.mxu1 %v2354_v1 }
 0x10c   :  { %729 = vmatmul.mubr.bf16.gmra.mrb[8].mxu0 %v287_v27  ;;  %2207 = vmatprep.subr.bf16.mxu1 %v2355_v31 }
 0x10d   :  { %736 = vmatprep.mubr.bf16.mxu0 %v293_v32  ;;  %2093 = vmatpush3.bf16.msra.mxu0 %v2361_v57 }
 0x10e   :  { %2094 = vmatprep.subr.bf16.mxu0 %v2363_v58 }
 0x10f   :  { %2208 = vmatpush3.bf16.msra.mxu1 %v2355_v31 }
 0x110   :  { %2209 = vmatprep.subr.bf16.mxu1 %v2356_v35 }
 0x111   :  { %2095 = vmatpush3.bf16.msra.mxu0 %v2364_v59 }
 0x112   :  { %672 = vmatmul.mubr.bf16.gmra.mrb[20].mxu1 %v290_v20  ;;  %2096 = vmatprep.subr.bf16.mxu0 %v2366_v60 }
 0x113   :  { %2210 = vmatpush3.bf16.msra.mxu1 %v2356_v35  ;;  %2213 = vmatprep.mubr.bf16.mxu1 %v279_v43 }
 0x114   :  { %737 = vmatmul.mubr.bf16.gmra.mrb[12].mxu0 %v292_v37  ;;  %2211 = vmatprep.subr.bf16.mxu1 %v2357_v40 }
 0x115   :  { %2097 = vmatpush3.bf16.msra.mxu0 %v2367_v62 }
 0x116   :  { %2098 = vmatprep.subr.bf16.mxu0 %v2369_v0 }
 0x117   :  { %2212 = vmatpush3.bf16.msra.mxu1 %v2357_v40 }
 0x118   :  { %2221 = vmatprep.subr.bf16.mxu1 %v2362_v56 }
 0x119   :  { %2099 = vmatpush3.bf16.msra.mxu0 %v2370_v2 }
 0x11a   :  { %2214 = vmatmul.mubr.bf16.vlgmr.msra.gmra.mrb[24].mxu1 %v284_v51  ;;  %2100 = vmatprep.subr.bf16.mxu0 %v2372_v5 }
 0x11b   :  { %2217 = vmatprep.mubr.bf16.mxu1 %v289_v46  ;;  %2222 = vmatpush3.bf16.msra.mxu1 %v2362_v56 }
 0x11c   :  { %2223 = vmatprep.subr.bf16.mxu1 %v2365_v45 }
 0x11d   :  { %2101 = vmatpush3.bf16.msra.mxu0 %v2373_v9 }
 0x11e   :  { %2102 = vmatprep.subr.bf16.mxu0 %v2375_v10 }
 0x11f   :  { %2224 = vmatpush3.bf16.msra.mxu1 %v2365_v45 }
 0x120   :  { %2225 = vmatprep.subr.bf16.mxu1 %v2368_v61 }
 0x121   :  { %2103 = vmatpush3.bf16.msra.mxu0 %v2376_v11  ;;  %v824_v11 = vsub.s32 3, %v2647_v47 }
 0x122   :  { %2218 = vmatmul.mubr.bf16.gmra.mrb[28].mxu1 %v294_v12  ;;  %2104 = vmatprep.subr.bf16.mxu0 %v2378_v14 }
 0x123   :  { %2226 = vmatpush3.bf16.msra.mxu1 %v2368_v61 }
 0x124   :  { %2227 = vmatprep.subr.bf16.mxu1 %v2371_v4 }
 0x125   :  { %2105 = vmatpush3.bf16.msra.mxu0 %v2379_v15 }
 0x127   :  { %2228 = vmatpush3.bf16.msra.mxu1 %v2371_v4  ;;  %v812_v4 = vsub.s32 2, %v2647_v47 }
 0x128   :  { %2229 = vmatprep.subr.bf16.mxu1 %v2374_v8 }
 0x12b   :  { %2230 = vmatpush3.bf16.msra.mxu1 %v2374_v8 }
 0x12c   :  { %2231 = vmatprep.subr.bf16.mxu1 %v2377_v13 }
 0x12f   :  { %2232 = vmatpush3.bf16.msra.mxu1 %v2377_v13 }
 0x130   :  { %2233 = vmatprep.subr.bf16.mxu1 %v2380_v6 }
 0x133   :  { %2234 = vmatpush3.bf16.msra.mxu1 %v2380_v6  ;;  %v813_v6 = vrot.slane %v2653_v49, %v812_v4 }
 0x134   :  { %2235 = vmatprep.subr.bf16.mxu1 %v2381_v16 }
 0x137   :  { %2236 = vmatpush3.bf16.msra.mxu1 %v2381_v16 }
 0x1cd   :  { %v2014_v17 = vpop.f32.mrb[8].mxu1 }
 0x1ce   :  { %v2015_v18 = vpop.f32.mrb[9].mxu1 }
 0x1cf   :  { %v2054_v19 = vpop.f32.mrb[0].mxu0  ;;  %v2016_v20 = vadd.f32 %v2015_v18, %v2014_v17  ;;  %v2017_v21 = vpop.f32.mrb[10].mxu1  ;;  %v825_v18 = vrot.slane %v2653_v49, %v824_v11 }
 0x1d0   :  { %v2055_v22 = vpop.f32.mrb[1].mxu0  ;;  %v2018_v23 = vpop.f32.mrb[11].mxu1 }
 0x1d1   :  { %v2056_v24 = vadd.f32 %v2055_v22, %v2054_v19  ;;  %v2057_v25 = vpop.f32.mrb[2].mxu0  ;;  %v2019_v26 = vadd.f32 %v2018_v23, %v2017_v21 }
 0x1d2   :  { %v2058_v27 = vpop.f32.mrb[3].mxu0 }
 0x1d3   :  { %v2059_v28 = vadd.f32 %v2058_v27, %v2057_v25  ;;  %v715_v29 = vadd.f32 %v2056_v24, %v2016_v20 }
 0x1d5   :  { %v2020_v30 = vpop.f32.mrb[12].mxu1  ;;  %v718_v1 = vadd.f32 %v2059_v28, %v2019_v26 }
 0x1d6   :  { %v2021_v32 = vpop.f32.mrb[13].mxu1 }
 0x1d7   :  { %v2060_v33 = vpop.f32.mrb[4].mxu0  ;;  %v2022_v34 = vadd.f32 %v2021_v32, %v2020_v30  ;;  %v2023_v36 = vpop.f32.mrb[14].mxu1 }
 0x1d8   :  { %v2061_v37 = vpop.f32.mrb[5].mxu0  ;;  %v2024_v7 = vpop.f32.mrb[15].mxu1 }
 0x1d9   :  { %v2062_v38 = vadd.f32 %v2061_v37, %v2060_v33  ;;  %v2063_v39 = vpop.f32.mrb[6].mxu0  ;;  %v2025_v41 = vadd.f32 %v2024_v7, %v2023_v36 }
 0x1da   :  { %v2064_v63 = vpop.f32.mrb[7].mxu0 }
 0x1db   :  { %v2065_v42 = vadd.f32 %v2064_v63, %v2063_v39  ;;  %v723_v43 = vadd.f32 %v2062_v38, %v2022_v34 }
 0x1dd   :  { %v2026_v51 = vpop.f32.mrb[16].mxu1  ;;  %v726_v52 = vadd.f32 %v2065_v42, %v2025_v41 }
 0x1de   :  { %v2027_v53 = vpop.f32.mrb[17].mxu1 }
 0x1df   :  { %v2066_v31 = vpop.f32.mrb[8].mxu0  ;;  %v2028_v46 = vadd.f32 %v2027_v53, %v2026_v51  ;;  %v2029_v3 = vpop.f32.mrb[18].mxu1 }
 0x1e0   :  { %v2067_v12 = vpop.f32.mrb[9].mxu0  ;;  %v2030_v35 = vpop.f32.mrb[19].mxu1 }
 0x1e1   :  { %v2068_v40 = vadd.f32 %v2067_v12, %v2066_v31  ;;  %v2069_v44 = vpop.f32.mrb[10].mxu0  ;;  %v2031_v54 = vadd.f32 %v2030_v35, %v2029_v3 }
 0x1e2   :  { %v2070_v55 = vpop.f32.mrb[11].mxu0 }
 0x1e3   :  { %v2071_v56 = vadd.f32 %v2070_v55, %v2069_v44  ;;  %v731_v57 = vadd.f32 %v2068_v40, %v2028_v46 }
 0x1e5   :  { %v2032_v58 = vpop.f32.mrb[20].mxu1  ;;  %v734_v59 = vadd.f32 %v2071_v56, %v2031_v54 }
 0x1e6   :  { %v2033_v45 = vpop.f32.mrb[21].mxu1 }
 0x1e7   :  { %v2072_v60 = vpop.f32.mrb[12].mxu0  ;;  %v2034_v61 = vadd.f32 %v2033_v45, %v2032_v58  ;;  %v2035_v62 = vpop.f32.mrb[22].mxu1 }
 0x1e8   :  { %v2073_v0 = vpop.f32.mrb[13].mxu0  ;;  %v2036_v2 = vpop.f32.mrb[23].mxu1 }
 0x1e9   :  { %v2074_v5 = vadd.f32 %v2073_v0, %v2072_v60  ;;  %v2075_v8 = vpop.f32.mrb[14].mxu0  ;;  %v2037_v9 = vadd.f32 %v2036_v2, %v2035_v62 }
 0x1ea   :  { %v2076_v10 = vpop.f32.mrb[15].mxu0 }
 0x1eb   :  { %v2077_v13 = vadd.f32 %v2076_v10, %v2075_v8  ;;  %v739_v14 = vadd.f32 %v2074_v5, %v2034_v61 }
 0x1ed   :  { %v2215_v15 = vpop.f32.mrb[24].mxu1  ;;  %v742_v16 = vadd.f32 %v2077_v13, %v2037_v9 }
 0x1ee   :  { %v788_v17 = vadd.f32 %v2215_v15, %v723_v43  ;;  %v779_v19 = vpop.f32.mrb[25].mxu1 }
 0x1ef   :  { %v780_v20 = vadd.f32 %v779_v19, %v715_v29  ;;  %v2216_v21 = vpop.f32.mrb[26].mxu1 }
 0x1f0   :  { %v816_v22 = vmul.f32 %v813_v6, %v788_v17  ;;  %v791_v23 = vadd.f32 %v2216_v21, %v726_v52  ;;  %v782_v24 = vpop.f32.mrb[27].mxu1 }
 0x1f1   :  { %v814_v25 = vmul.f32 %v813_v6, %v780_v20  ;;  %v783_v26 = vadd.f32 %v782_v24, %v718_v1 }
 0x1f2   :  { %v828_v27 = vadd.f32 %v825_v18, %v816_v22  ;;  %v817_v28 = vmul.f32 %v813_v6, %v791_v23 }
 0x1f3   :  { %v826_v30 = vadd.f32 %v825_v18, %v814_v25  ;;  %v815_v32 = vmul.f32 %v813_v6, %v783_v26 }
 0x1f4   :  { %v2856_v33 = vmax.f32 %v828_v27, 0.0  ;;  %v829_v34 = vadd.f32 %v825_v18, %v817_v28 }
 0x1f5   :  { %v834_v36 = vmax.f32 %v826_v30, 0.0  ;;  %v827_v37 = vadd.f32 %v825_v18, %v815_v32  ;;  %v2219_v7 = vpop.f32.mrb[28].mxu1 }
 0x1f6   :  { %v2858_v38 = vmax.f32 %v829_v34, 0.0  ;;  %v804_v39 = vadd.f32 %v2219_v7, %v739_v14  ;;  %v795_v29 = vpop.f32.mrb[29].mxu1  ;;  %v853_v41 = vrot.slane %v2856_v33, 1  ;;  %v876_v63 = vrot.slane %v2856_v33, 2 }
 0x1f7   :  { %v835_v42 = vmax.f32 %v827_v37, 0.0  ;;  %v796_v1 = vadd.f32 %v795_v29, %v731_v57  ;;  %v2220_v43 = vpop.f32.mrb[30].mxu1  ;;  %v850_v51 = vrot.slane %v834_v36, 1  ;;  %v873_v52 = vrot.slane %v834_v36, 2 }
 0x1f8   :  { %v878_v53 = vrot.slane %v2858_v38, 2  ;;  %v820_v31 = vmul.f32 %v813_v6, %v804_v39  ;;  %v807_v46 = vadd.f32 %v2220_v43, %v742_v16  ;;  %v798_v3 = vpop.f32.mrb[31].mxu1  ;;  %v855_v12 = vrot.slane %v2858_v38, 1  ;;  %v2382_v43 = vld [vmem:[%s3017_s2 + $0x148] sm:$0xff]  }
 0x1f9   :  { %v896_v35 = vpack.c.bf16 %v835_v42, %v834_v36  ;;  %v818_v40 = vmul.f32 %v813_v6, %v796_v1  ;;  %v799_v44 = vadd.f32 %v798_v3, %v734_v59  ;;  %v851_v54 = vrot.slane %v835_v42, 1 }
 0x1fa   :  { %v832_v55 = vadd.f32 %v825_v18, %v820_v31  ;;  %v821_v56 = vmul.f32 %v813_v6, %v807_v46  ;;  %v874_v58 = vrot.slane %v835_v42, 2  ;;  %v856_v45 = vsel %vm179_vm1, %v853_v41, %v855_v12 }
 0x1fb   :  { %v830_v57 = vadd.f32 %v825_v18, %v818_v40  ;;  %v819_v60 = vmul.f32 %v813_v6, %v799_v44  ;;  %v852_v61 = vsel %vm179_vm1, %v850_v51, %v851_v54  ;;  %v854_v62 = vsel %vm179_vm1, %v851_v54, %v853_v41  ;;  %v2383_v51 = vld [vmem:[%s3017_s2 + $0x150] sm:$0xff]  }
 0x1fc   :  { %v840_v0 = vmax.f32 %v832_v55, 0.0  ;;  %v833_v2 = vadd.f32 %v825_v18, %v821_v56  ;;  %v897_v5 = vpack.c.bf16 %v854_v62, %v852_v61  ;;  %v875_v8 = vsel %vm203_vm3, %v873_v52, %v874_v58  ;;  %v2384_v52 = vld [vmem:[%s3017_s2 + $0x158] sm:$0xff]  }
 0x1fd   :  { %v838_v9 = vmax.f32 %v830_v57, 0.0  ;;  %v831_v10 = vadd.f32 %v825_v18, %v819_v60  ;;  %v877_v59 = vsel %vm203_vm3, %v874_v58, %v876_v63  ;;  %v879_v13 = vsel %vm203_vm3, %v876_v63, %v878_v53 }
 0x1fe   :  { %v841_v14 = vmax.f32 %v833_v2, 0.0  ;;  %1132 = vmatprep.mubr.bf16.mxu0 %v897_v5  ;;  %v898_v15 = vpack.c.bf16 %v877_v59, %v875_v8  ;;  %v899_v6 = vpack.c.bf16 %v2858_v38, %v2856_v33  ;;  %v884_v20 = vrot.slane %v840_v0, 2 }
 0x1ff   :  { %v880_v16 = vrot.slane %v838_v9, 2  ;;  %v839_v17 = vmax.f32 %v831_v10, 0.0  ;;  %1133 = vmatmul.mubr.bf16.vlgmr.msra.gmra.mrb[16].mxu0 %v896_v35  ;;  %v857_v19 = vrot.slane %v838_v9, 1  ;;  %v861_v21 = vrot.slane %v840_v0, 1 }
 0x200   :  { %2237 = vmatprep.mubr.bf16.mxu1 %v898_v15  ;;  %v886_v22 = vrot.slane %v841_v14, 2  ;;  %v863_v23 = vrot.slane %v841_v14, 1  ;;  %v905_v18 = vpack.c.bf16 %v841_v14, %v840_v0  ;;  %v2462_v42 = vmov 0.0|0.0  }
 0x201   :  { %v858_v24 = vsel %vm179_vm1, %v855_v12, %v857_v19  ;;  %v881_v25 = vsel %vm203_vm3, %v878_v53, %v880_v16  ;;  %v882_v26 = vrot.slane %v839_v17, 2  ;;  %v859_v27 = vrot.slane %v839_v17, 1  ;;  %2296 = vmatprep.subr.bf16.mxu0 %v2462_v42 }
 0x202   :  { %v900_v28 = vpack.c.bf16 %v858_v24, %v856_v45  ;;  %v901_v30 = vpack.c.bf16 %v881_v25, %v879_v13  ;;  %v887_v32 = vsel %vm203_vm3, %v884_v20, %v886_v22  ;;  %v902_v33 = vpack.c.bf16 %v839_v17, %v838_v9 }
 0x203   :  { %v883_v34 = vsel %vm203_vm3, %v880_v16, %v882_v26  ;;  %v885_v36 = vsel %vm203_vm3, %v882_v26, %v884_v20  ;;  %v860_v37 = vsel %vm179_vm1, %v857_v19, %v859_v27  ;;  %v862_v7 = vsel %vm179_vm1, %v859_v27, %v861_v21 }
 0x204   :  { %1140 = vmatprep.mubr.bf16.mxu0 %v900_v28  ;;  %2238 = vmatmul.mubr.bf16.vlgmr.msra.gmra.mrb[32].mxu1 %v901_v30  ;;  %v904_v38 = vpack.c.bf16 %v885_v36, %v883_v34  ;;  %v903_v39 = vpack.c.bf16 %v862_v7, %v860_v37  ;;  %v907_v29 = vpack.c.bf16 %v886_v22, %v887_v32  ;;  %v2464_v1 = vmov 0.0  }
 0x205   :  { %v864_v41 = vsel %vm179_vm1, %v861_v21, %v863_v23  ;;  %2264 = vmatprep.subr.bf16.mxu1 %v2464_v1  ;;  %v1232_v46 = vsub.s32 4, %v2647_v47  ;;  %v1244_v40 = vsub.s32 5, %v2647_v47 }
 0x206   :  { %2241 = vmatprep.mubr.bf16.mxu1 %v904_v38  ;;  %v906_v63 = vpack.c.bf16 %v863_v23, %v864_v41  ;;  %2265 = vmatpush3.bf16.msra.mxu1 %v2382_v43 }
 0x207   :  { %1141 = vmatmul.mubr.bf16.gmra.mrb[20].mxu0 %v899_v6  ;;  %2266 = vmatprep.subr.bf16.mxu1 %v2464_v1  ;;  %v1233_v55 = vrot.slane %v2653_v49, %v1232_v46  ;;  %v1245_v45 = vrot.slane %v2653_v49, %v1244_v40 }
 0x208   :  { %1148 = vmatprep.mubr.bf16.mxu0 %v903_v39 }
 0x20a   :  { %2267 = vmatpush3.bf16.msra.mxu1 %v2383_v51 }
 0x20b   :  { %2268 = vmatprep.subr.bf16.mxu1 %v2464_v1 }
 0x20c   :  { %2242 = vmatmul.mubr.bf16.gmra.mrb[36].mxu1 %v907_v29 }
 0x20d   :  { %2272 = vmatprep.mubr.msk.bf16.mxu1 %vm2463_vm5, %v2464_v1 }
 0x20e   :  { %2269 = vmatpush3.bf16.msra.mxu1 %v2384_v52 }
 0x20f   :  { %1149 = vmatmul.mubr.bf16.gmra.mrb[24].mxu0 %v902_v33  ;;  %2270 = vmatprep.subr.bf16.mxu1 %v2464_v1 }
 0x210   :  { %1156 = vmatprep.mubr.bf16.mxu0 %v906_v63 }
 0x217   :  { %1157 = vmatmul.mubr.bf16.gmra.mrb[28].mxu0 %v905_v18 }
 0x218   :  { %2261 = vmatprep.mubr.msk.f32.mxu0 %vm2463_vm5, %v2464_v1 }
 0x2d2   :  { %v2106_v53 = vpop.f32.mrb[16].mxu0 }
 0x2d3   :  { %v2107_v31 = vpop.f32.mrb[17].mxu0 }
 0x2d4   :  { %v2108_v3 = vadd.f32 %v2107_v31, %v2106_v53  ;;  %v2109_v12 = vpop.f32.mrb[18].mxu0 }
 0x2d5   :  { %v2110_v35 = vpop.f32.mrb[19].mxu0 }
 0x2d6   :  { %v2111_v44 = vadd.f32 %v2110_v35, %v2109_v12 }
 0x2d7   :  { %v2239_v54 = vpop.f32.mrb[32].mxu1 }
 0x2d8   :  { %v1199_v56 = vpop.f32.mrb[33].mxu1 }
 0x2d9   :  { %v1200_v58 = vadd.f32 %v2108_v3, %v1199_v56  ;;  %v2240_v57 = vpop.f32.mrb[34].mxu1 }
 0x2da   :  { %v2112_v60 = vpop.f32.mrb[20].mxu0  ;;  %v1202_v61 = vpop.f32.mrb[35].mxu1 }
 0x2db   :  { %v1234_v62 = vmul.f32 %v1233_v55, %v1200_v58  ;;  %v1203_v0 = vadd.f32 %v2111_v44, %v1202_v61  ;;  %v2113_v2 = vpop.f32.mrb[21].mxu0 }
 0x2dc   :  { %v2114_v5 = vadd.f32 %v2113_v2, %v2112_v60  ;;  %v2115_v8 = vpop.f32.mrb[22].mxu0  ;;  %v2391_v2 = vld [vmem:[#allocation2 + $0x14] ss:$8 sps:$4 sm:$0xff]  }
 0x2dd   :  { %v1246_v9 = vadd.f32 %v1245_v45, %v1234_v62  ;;  %v1235_v10 = vmul.f32 %v1233_v55, %v1203_v0  ;;  %v2116_v59 = vpop.f32.mrb[23].mxu0  ;;  %v1262_v0 = vld [vmem:[%s3016_s1] sm:$0x3] }
 0x2de   :  { %v1208_v13 = vadd.f32 %v2239_v54, %v2114_v5  ;;  %v2117_v14 = vadd.f32 %v2116_v59, %v2115_v8  ;;  %v2389_v5 = vld [vmem:[#allocation2 + $0x10] ss:$8 sps:$4 sm:$0xff]   ;;  %v2394_v8 = vld [vmem:[#allocation2 + $0x24] ss:$8 sps:$4 sm:$0xff]  }
 0x2df   :  { %v1247_v15 = vadd.f32 %v1245_v45, %v1235_v10  ;;  %v2243_v6 = vpop.f32.mrb[36].mxu1  ;;  %v1254_v20 = vmax.f32 %v1246_v9, 0.0  ;;  %v2392_v9 = vld [vmem:[#allocation2 + $0x20] ss:$8 sps:$4 sm:$0xff]   ;;  %v2397_v10 = vld [vmem:[#allocation2 + $0x34] ss:$8 sps:$4 sm:$0xff]  }
 0x2e0   :  { %v1236_v16 = vmul.f32 %v1233_v55, %v1208_v13  ;;  %v1211_v17 = vadd.f32 %v2240_v57, %v2117_v14  ;;  %v1215_v19 = vpop.f32.mrb[37].mxu1  ;;  %v2395_v59 = vld [vmem:[#allocation2 + $0x30] ss:$8 sps:$4 sm:$0xff]   ;;  %v2400_v13 = vld [vmem:[#allocation2 + $0x44] ss:$8 sps:$4 sm:$0xff]  }
 0x2e1   :  { %v1255_v49 = vmax.f32 %v1247_v15, 0.0  ;;  %v2244_v21 = vpop.f32.mrb[38].mxu1  ;;  %v2398_v14 = vld [vmem:[#allocation2 + $0x40] ss:$8 sps:$4 sm:$0xff]   ;;  %v2403_v15 = vld [vmem:[#allocation2 + $0x54] ss:$8 sps:$4 sm:$0xff]  }
 0x2e2   :  { %v1248_v22 = vadd.f32 %v1245_v45, %v1236_v16  ;;  %v1237_v23 = vmul.f32 %v1233_v55, %v1211_v17  ;;  %v2118_v18 = vpop.f32.mrb[24].mxu0  ;;  %v1218_v24 = vpop.f32.mrb[39].mxu1  ;;  %v2406_v16 = vld [vmem:[#allocation2 + $0x64] ss:$8 sps:$4 sm:$0xff]   ;;  %v2404_v17 = vld [vmem:[#allocation2 + $0x60] ss:$8 sps:$4 sm:$0xff]  }
 0x2e3   :  { %v2297_v25 = vpack.c.bf16 %v1255_v49, %v1254_v20  ;;  %v2119_v26 = vpop.f32.mrb[25].mxu0 }
 0x2e4   :  { %v1249_v27 = vadd.f32 %v1245_v45, %v1237_v23  ;;  %v2120_v28 = vadd.f32 %v2119_v26, %v2118_v18  ;;  %v2121_v30 = vpop.f32.mrb[26].mxu0  ;;  %v1256_v33 = vmax.f32 %v1248_v22, 0.0  ;;  %v2409_v22 = vld [vmem:[#allocation2 + $0x74] ss:$8 sps:$4 sm:$0xff]   ;;  %v2466_v23 = vmov 0   ;;  %v2410_v18 = vld [vmem:[%s3017_s2 + $0x1a8] sm:$0xff]  }
 0x2e5   :  { %v2122_v32 = vpop.f32.mrb[27].mxu0  ;;  %2298 = vmatpush3.bf16.msra.mxu0 %v2297_v25  ;;  %v2412_v25 = vld [vmem:[%s3017_s2 + $0x1b0] sm:$0xff]  }
 0x2e6   :  { %v1257_v34 = vmax.f32 %v1249_v27, 0.0  ;;  %v1216_v36 = vadd.f32 %v2120_v28, %v1215_v19  ;;  %v2123_v37 = vadd.f32 %v2122_v32, %v2121_v30  ;;  %2299 = vmatprep.subr.bf16.mxu0 %v2462_v42  ;;  %v2413_v26 = vld [vmem:[%s3017_s2 + $0x170] sm:$0xff]   ;;  %v2414_v27 = vld [vmem:[%s3017_s2 + $0x1b8] sm:$0xff]   ;;  %v2416_v30 = vld [vmem:[%s3017_s2 + $0x1c0] sm:$0xff]  }
 0x2e7   :  { %v2415_v28 = vld [vmem:[%s3017_s2 + $0x178] sm:$0xff]   ;;  %v2417_v32 = vld [vmem:[%s3017_s2 + $0x180] sm:$0xff]  }
 0x2e8   :  { %v1238_v7 = vmul.f32 %v1233_v55, %v1216_v36  ;;  %v1219_v38 = vadd.f32 %v2123_v37, %v1218_v24  ;;  %v2300_v39 = vpack.c.bf16 %v1257_v34, %v1256_v33  ;;  %v2411_v24 = vld [vmem:[%s3017_s2 + $0x168] sm:$0xff]   ;;  %v2420_v36 = vld [vmem:[%s3017_s2 + $0x1d0] sm:$0xff]  }
 0x2e9   :  { %v2418_v33 = vld [vmem:[%s3017_s2 + $0x1c8] sm:$0xff]   ;;  %v2421_v37 = vld [vmem:[%s3017_s2 + $0x190] sm:$0xff]  }
 0x2ea   :  { %v1250_v29 = vadd.f32 %v1245_v45, %v1238_v7  ;;  %v1239_v41 = vmul.f32 %v1233_v55, %v1219_v38  ;;  %v2124_v63 = vpop.f32.mrb[28].mxu0  ;;  %2301 = vmatpush3.bf16.msra.mxu0 %v2300_v39  ;;  %v2419_v34 = vld [vmem:[%s3017_s2 + $0x188] sm:$0xff]   ;;  %v1352_v7 = vsub.s32 6, %v2647_v47  ;;  %v2434_v38 = vld [vmem:[%s3020_s5] sm:$0xff] }
 0x2eb   :  { %v2125_v43 = vpop.f32.mrb[29].mxu0  ;;  %2302 = vmatprep.subr.bf16.mxu0 %v2462_v42 }
 0x2ec   :  { %v1251_v51 = vadd.f32 %v1245_v45, %v1239_v41  ;;  %v2126_v52 = vadd.f32 %v2125_v43, %v2124_v63  ;;  %v2127_v53 = vpop.f32.mrb[30].mxu0  ;;  %v1258_v46 = vmax.f32 %v1250_v29, 0.0  ;;  %v1353_v39 = vrot.slane %v2434_v38, %v1352_v7 }
 0x2ed   :  { %v2128_v31 = vpop.f32.mrb[31].mxu0 }
 0x2ee   :  { %v1259_v3 = vmax.f32 %v1251_v51, 0.0  ;;  %v1224_v12 = vadd.f32 %v2243_v6, %v2126_v52  ;;  %v2129_v35 = vadd.f32 %v2128_v31, %v2127_v53  ;;  %v2401_v6 = vld [vmem:[#allocation2 + $0x50] ss:$8 sps:$4 sm:$0xff]  }
 0x2ef   :  { %v2422_v31 = vld [vmem:[%s3017_s2 + $0x1d8] sm:$0xff]  }
 0x2f0   :  { %v1240_v40 = vmul.f32 %v1233_v55, %v1224_v12  ;;  %v1227_v44 = vadd.f32 %v2244_v21, %v2129_v35  ;;  %v2303_v54 = vpack.c.bf16 %v1259_v3, %v1258_v46  ;;  %v2407_v21 = vld [vmem:[#allocation2 + $0x70] ss:$8 sps:$4 sm:$0xff]   ;;  %v2424_v3 = vld [vmem:[%s3017_s2 + $0x1e0] sm:$0xff]  }
 0x2f1   :  { %v2423_v46 = vld [vmem:[%s3017_s2 + $0x198] sm:$0xff]   ;;  %v2425_v12 = vld [vmem:[%s3017_s2 + $0x1a0] sm:$0xff]  }
 0x2f2   :  { %v1252_v56 = vadd.f32 %v1245_v45, %v1240_v40  ;;  %v1241_v58 = vmul.f32 %v1233_v55, %v1227_v44  ;;  %2304 = vmatpush3.bf16.msra.mxu0 %v2303_v54  ;;  %v2385_v55 = vld [vmem:[%s3017_s2 + $0x160] sm:$0xff]   ;;  %v2427_v40 = vld [vmem:[%s3018_s3 + $0xc8] sm:$0xff]   ;;  %v2428_v44 = vld [vmem:[%s3018_s3 + $0xd0] sm:$0xff]  }
 0x2f3   :  { %2305 = vmatprep.subr.bf16.mxu0 %v2462_v42  ;;  %2271 = vmatpush3.bf16.msra.mxu1 %v2385_v55  ;;  %v2386_v42 = vld [vmem:[#allocation2] ss:$8 sps:$4 sm:$0xff]   ;;  %v2429_v54 = vld [vmem:[%s3018_s3 + $0xd8] sm:$0xff]  }
 0x2f4   :  { %v1253_v57 = vadd.f32 %v1245_v45, %v1241_v58  ;;  %v1260_v60 = vmax.f32 %v1252_v56, 0.0  ;;  %v2388_v45 = vld [vmem:[#allocation2 + $0x4] ss:$8 sps:$4 sm:$0xff]   ;;  %2156 = vmatprep.subr.bf16.mxu1 %v2410_v18 }
 0x2f5   :  { %v2426_v35 = vld [vmem:[%s3018_s3 + $0xc0] sm:$0xff]   ;;  %v2431_v58 = vld [vmem:[%s3018_s3 + $0xe8] sm:$0xff]  }
 0x2f6   :  { %v1261_v61 = vmax.f32 %v1253_v57, 0.0  ;;  %v2430_v56 = vld [vmem:[%s3018_s3 + $0xe0] sm:$0xff]   ;;  %v1442_v57 = vsub.s32 7, %v2647_v47 }
 0x2f8   :  { %v2306_v62 = vpack.c.bf16 %v1261_v61, %v1260_v60  ;;  %v39_v60 = vld [vmem:[%s3020_s5 + $0x8] sm:$0xff]  ;;  %v1443_v61 = vrot.slane %v2434_v38, %v1442_v57 }
 0x2fa   :  { %2308 = vmatpush3.bf16.msk.msra.mxu0 %vm2307_vm8, %v2306_v62  ;;  %v1447_v62 = vrot.slane %v39_v60, %v1442_v57 }
 0x2fb   :  { %1528 = vmatprep.subr.bf16.mxu0 %v2388_v45 }
 0x2fd   :  { %2262 = vmatmul.mubr.msk.f32.vlgmr.msra.gmra.mrb[32].mxu0 %vm1263_vm9, %v1262_v0 }
 0x2fe   :  { %1529 = vmatpush1.bf16.msra.mxu0 %v2386_v42  ;;  %1560 = vmatprep.mubr.bf16.mxu0 %v2466_v23 }
 0x2ff   :  { %1530 = vmatprep.subr.bf16.mxu0 %v2391_v2 }
 0x302   :  { %1531 = vmatpush1.bf16.msra.mxu0 %v2389_v5 }
 0x303   :  { %1532 = vmatprep.subr.bf16.mxu0 %v2394_v8 }
 0x306   :  { %1533 = vmatpush1.bf16.msra.mxu0 %v2392_v9 }
 0x307   :  { %1534 = vmatprep.subr.bf16.mxu0 %v2397_v10 }
 0x30a   :  { %1535 = vmatpush1.bf16.msra.mxu0 %v2395_v59 }
 0x30b   :  { %1536 = vmatprep.subr.bf16.mxu0 %v2400_v13  ;;  %v2432_v13 = vld [vmem:[%s3018_s3 + $0xf0] sm:$0xff]  }
 0x30e   :  { %1537 = vmatpush1.bf16.msra.mxu0 %v2398_v14  ;;  %v2433_v14 = vld [vmem:[%s3018_s3 + $0xf8] sm:$0xff]  }
 0x30f   :  { %1538 = vmatprep.subr.bf16.mxu0 %v2403_v15  ;;  %v40_v15 = vld [vmem:[%s3020_s5 + $0x10] sm:$0xff] }
 0x312   :  { %1539 = vmatpush1.bf16.msra.mxu0 %v2401_v6 }
 0x313   :  { %1540 = vmatprep.subr.bf16.mxu0 %v2406_v16  ;;  %v1608_v16 = vrot.slane %v40_v15, %v141_v48 }
 0x316   :  { %1541 = vmatpush1.bf16.msra.mxu0 %v2404_v17 }
 0x317   :  { %1542 = vmatprep.subr.bf16.mxu0 %v2409_v22 }
 0x31a   :  { %1543 = vmatpush1.bf16.msra.mxu0 %v2407_v21 }
 0x31b   :  { %2276 = vmatprep.subr.bf16.mxu0 %v2464_v1 }
 0x3d0   :  { %v1337_v19 = vpop.f32.mrb[32].mxu0 }
 0x3d1   :  { %v1341_v20 = vpack.c.bf16 %v1337_v19, %v1337_v19  ;;  %v2263_v49 = vpop.f32.mrb[33].mxu0 }
 0x3d3   :  { %2273 = vmatmul.mubr.msk.bf16.vlgmr.msra.gmra.mrb[40].mxu1 %vm1378_vm10, %v1341_v20 }
 0x3d4   :  { %2157 = vmatpush3.bf16.msra.mxu1 %v2411_v24 }
 0x3d5   :  { %2158 = vmatprep.subr.bf16.mxu1 %v2412_v25 }
 0x3d8   :  { %2159 = vmatpush3.bf16.msra.mxu1 %v2413_v26  ;;  %v1859_v26 = vrot.slane %v40_v15, %v812_v4 }
 0x3d9   :  { %2160 = vmatprep.subr.bf16.mxu1 %v2414_v27 }
 0x3dc   :  { %2161 = vmatpush3.bf16.msra.mxu1 %v2415_v28 }
 0x3dd   :  { %2162 = vmatprep.subr.bf16.mxu1 %v2416_v30 }
 0x3e0   :  { %2163 = vmatpush3.bf16.msra.mxu1 %v2417_v32 }
 0x3e1   :  { %2164 = vmatprep.subr.bf16.mxu1 %v2418_v33  ;;  %v1868_v33 = vrot.slane %v40_v15, %v824_v11 }
 0x3e4   :  { %2165 = vmatpush3.bf16.msra.mxu1 %v2419_v34 }
 0x3e5   :  { %2166 = vmatprep.subr.bf16.mxu1 %v2420_v36 }
 0x3e8   :  { %2167 = vmatpush3.bf16.msra.mxu1 %v2421_v37 }
 0x3e9   :  { %2168 = vmatprep.subr.bf16.mxu1 %v2422_v31 }
 0x3ec   :  { %2169 = vmatpush3.bf16.msra.mxu1 %v2423_v46 }
 0x3ed   :  { %2170 = vmatprep.subr.bf16.mxu1 %v2424_v3 }
 0x3f0   :  { %2171 = vmatpush3.bf16.msra.mxu1 %v2425_v12 }
 0x4a6   :  { %v1416_v29 = vpop.f32.mrb[40].mxu1 }
 0x4a7   :  { %v1417_v41 = vadd.f32 %v1416_v29, %v1353_v39  ;;  %v2274_v63 = vpop.f32.mrb[41].mxu1 }
 0x4a8   :  { %v1419_v43 = vpop.f32.mrb[42].mxu1 }
 0x4a9   :  { %v1422_v51 = vmax.f32 %v1417_v41, 0.0  ;;  %v2275_v52 = vpop.f32.mrb[43].mxu1 }
 0x4ab   :  { %v1423_v53 = vpack.c.bf16 %v1422_v51, %v1422_v51 }
 0x4ad   :  { %1561 = vmatmul.mubr.bf16.vlgmr.msra.gmra.mrb[36].mxu0 %v1423_v53 }
 0x4ae   :  { %2292 = vmatprep.mubr.msk.bf16.mxu0 %vm2463_vm5, %v2464_v1  ;;  %2277 = vmatpush3.bf16.msra.mxu0 %v2426_v35 }
 0x4af   :  { %2278 = vmatprep.subr.bf16.mxu0 %v2464_v1 }
 0x4b2   :  { %2279 = vmatpush3.bf16.msra.mxu0 %v2427_v40 }
 0x4b3   :  { %2280 = vmatprep.subr.bf16.mxu0 %v2464_v1 }
 0x4b6   :  { %2281 = vmatpush3.bf16.msra.mxu0 %v2428_v44 }
 0x4b7   :  { %2282 = vmatprep.subr.bf16.mxu0 %v2464_v1 }
 0x4ba   :  { %2283 = vmatpush3.bf16.msra.mxu0 %v2429_v54 }
 0x4bb   :  { %2284 = vmatprep.subr.bf16.mxu0 %v2464_v1 }
 0x4be   :  { %2285 = vmatpush3.bf16.msra.mxu0 %v2430_v56 }
 0x4bf   :  { %2286 = vmatprep.subr.bf16.mxu0 %v2464_v1 }
 0x4c2   :  { %2287 = vmatpush3.bf16.msra.mxu0 %v2431_v58 }
 0x4c3   :  { %2288 = vmatprep.subr.bf16.mxu0 %v2464_v1 }
 0x4c6   :  { %2289 = vmatpush3.bf16.msra.mxu0 %v2432_v13 }
 0x4c7   :  { %2290 = vmatprep.subr.bf16.mxu0 %v2464_v1  ;;  %v1766_v1 = vrot.slane %v40_v15, %v153_v50 }
 0x4ca   :  { %2291 = vmatpush3.bf16.msra.mxu0 %v2433_v14 }
 0x580   :  { %v1562_v0 = vpop.f32.mrb[36].mxu0 }
 0x581   :  { %v1563_v55 = vadd.f32 %v1562_v0, %v1443_v61  ;;  %v1564_v42 = vpop.f32.mrb[37].mxu0 }
 0x582   :  { %v1565_v45 = vadd.f32 %v1564_v42, %v1447_v62  ;;  %v1566_v2 = vpop.f32.mrb[38].mxu0 }
 0x583   :  { %v1569_v5 = vmax.f32 %v1563_v55, 0.0  ;;  %v1567_v8 = vpop.f32.mrb[39].mxu0 }
 0x584   :  { %v1570_v9 = vmax.f32 %v1565_v45, 0.0 }
 0x585   :  { %v1571_v59 = vpack.c.bf16 %v1569_v5, %v1569_v5 }
 0x586   :  { %v1572_v10 = vpack.c.bf16 %v1570_v9, %v1570_v9 }
 0x588   :  { %1737 = vmatprep.mubr.bf16.mxu1 %v1572_v10 }
 0x589   :  { %1738 = vmatmul.mubr.bf16.vlgmr.msra.gmra.mrb[44].mxu1 %v1571_v59 }
 0x65c   :  { %v2172_v6 = vpop.f32.mrb[44].mxu1 }
 0x65d   :  { %v2173_v17 = vpop.f32.mrb[45].mxu1 }
 0x65e   :  { %v2174_v19 = vadd.f32 %v2173_v17, %v2172_v6  ;;  %v2175_v20 = vpop.f32.mrb[46].mxu1 }
 0x65f   :  { %v2176_v49 = vpop.f32.mrb[47].mxu1 }
 0x660   :  { %v1740_v21 = vadd.f32 %v2174_v19, %v1608_v16 }
 0x662   :  { %v1745_v22 = vmax.f32 %v1740_v21, 0.0 }
 0x664   :  { %v1746_v23 = vpack.c.bf16 %v1745_v22, %v1745_v22 }
 0x666   :  { %2293 = vmatmul.mubr.bf16.vlgmr.msra.gmra.mrb[40].mxu0 %v1746_v23 }
 0x739   :  { %v1849_v18 = vpop.f32.mrb[40].mxu0 }
 0x73a   :  { %v1850_v24 = vadd.f32 %v1849_v18, %v1766_v1  ;;  %v2294_v25 = vpop.f32.mrb[41].mxu0 }
 0x73b   :  { %v1852_v27 = vpop.f32.mrb[42].mxu0 }
 0x73c   :  { %v1855_v28 = vmax.f32 %v1850_v24, 0.0  ;;  %v2295_v48 = vpop.f32.mrb[43].mxu0 }
 0x73e   :  { %v1860_v30 = vmul.f32 %v1859_v26, %v1855_v28 }
 0x740   :  { %v1862_v32 = vsel %vm1861_vm11, %v1860_v30, 0.0 }
 0x741   :  { %1863 = vadd.xlane.f32.xlu0 %v1862_v32 }
 0x7ce   :  { %v1864_v34 = vpop.xlane.xlu0 %1863 }
 0x7cf   :  { %v1869_v36 = vadd.f32 %v1868_v33, %v1864_v34 }
 0x7d1   :  { %1871 = vst.msk [vmem:[%s3021_s6] sm:$0x3] %vm1870_vm12, %v1869_v36 }
 0x7d2   :  { %1876 = vsyncpa [#allocation3], 1 }

</bundles_post_ra>
